<compile_context>
chip_gen: v5e
topology: v5e:2x2
jax: 0.10.0
libtpu: 0.0.40
codegen_flags: <defaults>
</compile_context>

<pallas_src>
import functools

import jax
import jax.numpy as jnp
import numpy as np
from jax import lax
from jax.experimental import pallas as pl
from jax.experimental.pallas import tpu as pltpu


# ----------------------------------------------------------------------------
# Kernel
# ----------------------------------------------------------------------------
def _cum_inorm_kernel(x_ref, g_ref, b_ref, o_ref, *, eps):
    # x_ref: (bn, T, F)  rows = folded (batch, channel)
    # g_ref / b_ref: (bn, 1, F)  per-row affine (constant along T and F)
    x = x_ref[...].astype(jnp.float32)                      # (bn, T, F)
    bn, T, F = x.shape

    # Per-frame statistics: reduce over the frequency (lane) axis first so the
    # causal prefix-sum below runs on (bn, T, 1) instead of (bn, T, F).
    s1 = jnp.sum(x, axis=-1, keepdims=True)                 # (bn, T, 1) frame sum
    s2 = jnp.sum(x * x, axis=-1, keepdims=True)             # (bn, T, 1) frame pow sum

    # Lower-triangular (incl. diagonal) ones matrix: tri[t, s] = 1 iff s <= t.
    row = lax.broadcasted_iota(jnp.int32, (T, T), 0)
    col = lax.broadcasted_iota(jnp.int32, (T, T), 1)
    tri = jnp.where(col <= row, 1.0, 0.0).astype(jnp.float32)
    tri_b = jnp.broadcast_to(tri[None], (bn, T, T))         # hoisted once per step

    # Causal prefix sums over time via one batched MXU matmul per statistic:
    #   cs1[n, t, 0] = sum_{s<=t} s1[n, s, 0]   (cum_sum)
    #   cs2[n, t, 0] = sum_{s<=t} s2[n, s, 0]   (cum_pow_sum)
    dnums = (((2,), (1,)), ((0,), (0,)))                    # contract s, batch n
    cs1 = lax.dot_general(tri_b, s1, dnums, preferred_element_type=jnp.float32)
    cs2 = lax.dot_general(tri_b, s2, dnums, preferred_element_type=jnp.float32)

    # entry_cnt[t] = (t + 1) * F
    t_idx = lax.broadcasted_iota(jnp.int32, (bn, T, 1), 1).astype(jnp.float32)
    inv_cnt = pl.reciprocal((t_idx + 1.0) * float(F), approx=False)

    cum_mean = cs1 * inv_cnt                                 # (bn, T, 1)
    cum_var = (cs2 - 2.0 * cum_mean * cs1) * inv_cnt + cum_mean * cum_mean
    inv_std = lax.rsqrt(cum_var + eps)                       # EUP, no divide/sqrt

    xn = (x - cum_mean) * inv_std                            # lane broadcast of (bn,T,1)
    o_ref[...] = (xn * g_ref[...] + b_ref[...]).astype(o_ref.dtype)


# ----------------------------------------------------------------------------
# Wrapper
# ----------------------------------------------------------------------------
def _pick_block_rows(N, T, F, budget_bytes=8 << 20):
    """Largest divisor of N whose per-step f32 working set fits the budget."""
    # per-row: ~3 f32 copies of the (T, F) tile + the (T, T) triangular operand
    per_row = 4 * (3 * T * F + T * T) + 32 * T
    cap = max(1, min(N, budget_bytes // max(per_row, 1)))
    best = 1
    for d in range(1, int(cap) + 1):
        if N % d == 0:
            best = d
    return best


def cumulative_instance_norm_2d(x, gain, bias, *, eps=1e-5, block_rows=None):
    """x: (B, C, T, F); gain/bias: (1, C, 1, 1) or (C,) per-channel affine."""
    B, C, T, F = x.shape
    N = B * C
    bn = block_rows if block_rows is not None else _pick_block_rows(N, T, F)
    bn = max(1, min(bn, N))
    if N % bn:                                               # keep blocks exact
        bn = _pick_block_rows(N, T, F)
    grid = (N // bn,)

    x_rows = x.reshape(N, T, F)
    g4 = jnp.reshape(gain.astype(x.dtype), (1, C, 1, 1))
    b4 = jnp.reshape(bias.astype(x.dtype), (1, C, 1, 1))
    # Pre-broadcast per-channel affine to lane rows (tiny: N*F elements).
    g_rows = jnp.broadcast_to(g4, (B, C, 1, F)).reshape(N, 1, F)
    b_rows = jnp.broadcast_to(b4, (B, C, 1, F)).reshape(N, 1, F)

    kernel = functools.partial(_cum_inorm_kernel, eps=eps)
    out = pl.pallas_call(
        kernel,
        out_shape=jax.ShapeDtypeStruct((N, T, F), x.dtype),
        grid=grid,
        in_specs=[
            pl.BlockSpec((bn, T, F), lambda i: (i, 0, 0)),
            pl.BlockSpec((bn, 1, F), lambda i: (i, 0, 0)),
            pl.BlockSpec((bn, 1, F), lambda i: (i, 0, 0)),
        ],
        out_specs=pl.BlockSpec((bn, T, F), lambda i: (i, 0, 0)),
        compiler_params=pltpu.CompilerParams(
            dimension_semantics=("parallel",)),              # shard rows over TCs
    )(x_rows, g_rows, b_rows)
    return out.reshape(B, C, T, F)


# ----------------------------------------------------------------------------
# Pure-JAX reference (faithful translation of the PyTorch forward)
# ----------------------------------------------------------------------------
def reference_forward(x, gain, bias, *, eps=1e-5):
    B, C, T, F = x.shape
    g = jnp.reshape(gain, (1, C, 1, 1)).astype(x.dtype)
    b = jnp.reshape(bias, (1, C, 1, 1)).astype(x.dtype)
    step_sum = jnp.sum(x, axis=3, keepdims=True)
    step_pow_sum = jnp.sum(x * x, axis=3, keepdims=True)
    cum_sum = jnp.cumsum(step_sum, axis=2)
    cum_pow_sum = jnp.cumsum(step_pow_sum, axis=2)
    entry_cnt = (jnp.arange(1, T + 1, dtype=x.dtype) * F).reshape(1, 1, T, 1)
    cum_mean = cum_sum / entry_cnt
    cum_var = (cum_pow_sum - 2.0 * cum_mean * cum_sum) / entry_cnt + cum_mean ** 2
    cum_std = jnp.sqrt(cum_var + eps)
    x_hat = (x - cum_mean) / cum_std
    return x_hat * g + b


# ----------------------------------------------------------------------------
if __name__ == "__main__":
    B, C, T, F = 2, 4, 16, 16
    eps = 1e-5

    key = jax.random.PRNGKey(0)
    kx, kg, kb = jax.random.split(key, 3)
    x = jax.random.normal(kx, (B, C, T, F), jnp.float32)
    gain = (1.0 + 0.1 * jax.random.normal(kg, (1, C, 1, 1))).astype(jnp.float32)
    bias = (0.1 * jax.random.normal(kb, (1, C, 1, 1))).astype(jnp.float32)

    fwd = jax.jit(functools.partial(cumulative_instance_norm_2d, eps=eps))
    out = jax.block_until_ready(fwd(x, gain, bias))

    ref = reference_forward(x, gain, bias, eps=eps)
    assert out.shape == (B, C, T, F), out.shape
    np.testing.assert_allclose(np.asarray(out), np.asarray(ref), rtol=2e-3, atol=2e-3)
    print("KERNEL_OK")
</pallas_src>

<mosaic_0001>
module attributes {stable_mosaic.version = 11 : i64} {
  func.func @_cum_inorm_kernel(%arg0: i32, %arg1: memref<8x16x16xf32, #tpu.memory_space<vmem>>, %arg2: memref<8x1x16xf32, #tpu.memory_space<vmem>>, %arg3: memref<8x1x16xf32, #tpu.memory_space<vmem>>, %arg4: memref<8x16x16xf32, #tpu.memory_space<vmem>>) attributes {dimension_semantics = [#tpu.dimension_semantics<parallel>], iteration_bounds = array<i64: 1>, scalar_prefetch = 0 : i64, scratch_operands = 0 : i64, tpu.core_type = #tpu.core_type<tc>, window_params = [{transform_indices = @transform_0, window_bounds = array<i64: 8, 16, 16>}, {transform_indices = @transform_1, window_bounds = array<i64: 8, 1, 16>}, {transform_indices = @transform_2, window_bounds = array<i64: 8, 1, 16>}, {transform_indices = @transform_3, window_bounds = array<i64: 8, 16, 16>}]} {
    %c0 = arith.constant 0 : index
    %c0_0 = arith.constant 0 : index
    %c0_1 = arith.constant 0 : index
    %0 = vector.load %arg1[%c0, %c0_0, %c0_1] : memref<8x16x16xf32, #tpu.memory_space<vmem>>, vector<8x16x16xf32>
    %cst = arith.constant dense<0.000000e+00> : vector<8x16xf32>
    %1 = vector.multi_reduction <add>, %0, %cst [2] : vector<8x16x16xf32> to vector<8x16xf32>
    %2 = vector.shape_cast %1 : vector<8x16xf32> to vector<8x16x1xf32>
    %3 = arith.mulf %0, %0 : vector<8x16x16xf32>
    %cst_2 = arith.constant dense<0.000000e+00> : vector<8x16xf32>
    %4 = vector.multi_reduction <add>, %3, %cst_2 [2] : vector<8x16x16xf32> to vector<8x16xf32>
    %5 = vector.shape_cast %4 : vector<8x16xf32> to vector<8x16x1xf32>
    %6 = tpu.iota {dimensions = array<i32: 0>} : vector<16x16xi32>
    %7 = tpu.iota {dimensions = array<i32: 1>} : vector<16x16xi32>
    %8 = arith.cmpi sle, %7, %6 : vector<16x16xi32>
    %cst_3 = arith.constant 1.000000e+00 : f32
    %cst_4 = arith.constant 0.000000e+00 : f32
    %9 = vector.broadcast %cst_3 : f32 to vector<16x16xf32>
    %10 = vector.broadcast %cst_4 : f32 to vector<16x16xf32>
    %11 = arith.select %8, %9, %10 : vector<16x16xi1>, vector<16x16xf32>
    %12 = vector.shape_cast %11 : vector<16x16xf32> to vector<1x16x16xf32>
    %13 = vector.shape_cast %12 : vector<1x16x16xf32> to vector<1x16x16xf32>
    %14 = vector.broadcast %13 : vector<1x16x16xf32> to vector<8x16x16xf32>
    %cst_5 = arith.constant dense<0.000000e+00> : vector<8x16x1xf32>
    %15 = tpu.matmul %14, %2, %cst_5 {dimension_numbers = #tpu.dot_dimension_numbers<[2], [1], [1], [2], [0, 0, 0, 1, 1, 2], [0], [0]>} : vector<8x16x16xf32>, vector<8x16x1xf32>, vector<8x16x1xf32> -> vector<8x16x1xf32>
    %cst_6 = arith.constant dense<0.000000e+00> : vector<8x16x1xf32>
    %16 = tpu.matmul %14, %5, %cst_6 {dimension_numbers = #tpu.dot_dimension_numbers<[2], [1], [1], [2], [0, 0, 0, 1, 1, 2], [0], [0]>} : vector<8x16x16xf32>, vector<8x16x1xf32>, vector<8x16x1xf32> -> vector<8x16x1xf32>
    %17 = tpu.iota {dimensions = array<i32: 1>} : vector<8x16x1xi32>
    %18 = arith.sitofp %17 : vector<8x16x1xi32> to vector<8x16x1xf32>
    %cst_7 = arith.constant 1.000000e+00 : f32
    %19 = vector.broadcast %cst_7 : f32 to vector<8x16x1xf32>
    %20 = arith.addf %18, %19 : vector<8x16x1xf32>
    %cst_8 = arith.constant 1.600000e+01 : f32
    %21 = vector.broadcast %cst_8 : f32 to vector<8x16x1xf32>
    %22 = arith.mulf %20, %21 : vector<8x16x1xf32>
    %23 = tpu.reciprocal %22 : vector<8x16x1xf32> -> vector<8x16x1xf32>
    %24 = arith.mulf %15, %23 : vector<8x16x1xf32>
    %cst_9 = arith.constant 2.000000e+00 : f32
    %25 = vector.broadcast %cst_9 : f32 to vector<8x16x1xf32>
    %26 = arith.mulf %25, %24 : vector<8x16x1xf32>
    %27 = arith.mulf %26, %15 : vector<8x16x1xf32>
    %28 = arith.subf %16, %27 : vector<8x16x1xf32>
    %29 = arith.mulf %28, %23 : vector<8x16x1xf32>
    %30 = arith.mulf %24, %24 : vector<8x16x1xf32>
    %31 = arith.addf %29, %30 : vector<8x16x1xf32>
    %cst_10 = arith.constant 9.99999974E-6 : f32
    %32 = vector.broadcast %cst_10 : f32 to vector<8x16x1xf32>
    %33 = arith.addf %31, %32 : vector<8x16x1xf32>
    %34 = math.rsqrt %33 : vector<8x16x1xf32>
    %35 = vector.broadcast %24 : vector<8x16x1xf32> to vector<8x16x16xf32>
    %36 = arith.subf %0, %35 : vector<8x16x16xf32>
    %37 = vector.broadcast %34 : vector<8x16x1xf32> to vector<8x16x16xf32>
    %38 = arith.mulf %36, %37 : vector<8x16x16xf32>
    %c0_11 = arith.constant 0 : index
    %c0_12 = arith.constant 0 : index
    %c0_13 = arith.constant 0 : index
    %39 = vector.load %arg2[%c0_11, %c0_12, %c0_13] : memref<8x1x16xf32, #tpu.memory_space<vmem>>, vector<8x1x16xf32>
    %40 = vector.broadcast %39 : vector<8x1x16xf32> to vector<8x16x16xf32>
    %41 = arith.mulf %38, %40 : vector<8x16x16xf32>
    %c0_14 = arith.constant 0 : index
    %c0_15 = arith.constant 0 : index
    %c0_16 = arith.constant 0 : index
    %42 = vector.load %arg3[%c0_14, %c0_15, %c0_16] : memref<8x1x16xf32, #tpu.memory_space<vmem>>, vector<8x1x16xf32>
    %43 = vector.broadcast %42 : vector<8x1x16xf32> to vector<8x16x16xf32>
    %44 = arith.addf %41, %43 : vector<8x16x16xf32>
    %c0_17 = arith.constant 0 : index
    %c0_18 = arith.constant 0 : index
    %c0_19 = arith.constant 0 : index
    %45 = vector.load %arg4[%c0_17, %c0_18, %c0_19] : memref<8x16x16xf32, #tpu.memory_space<vmem>>, vector<8x16x16xf32>
    tpu.vector_store %arg4[%c0_17, %c0_18, %c0_19], %44 {strides = array<i32>} : memref<8x16x16xf32, #tpu.memory_space<vmem>>, vector<8x16x16xf32>,
    return
  }
  func.func @transform_0(%arg0: i32) -> (i32, i32, i32) {
    %c0_i32 = arith.constant 0 : i32
    %c0_i32_0 = arith.constant 0 : i32
    %c0_i32_1 = arith.constant 0 : i32
    return %arg0, %c0_i32, %c0_i32_0 : i32, i32, i32
  }
  func.func @transform_1(%arg0: i32) -> (i32, i32, i32) {
    %c0_i32 = arith.constant 0 : i32
    %c0_i32_0 = arith.constant 0 : i32
    %c0_i32_1 = arith.constant 0 : i32
    return %arg0, %c0_i32, %c0_i32_0 : i32, i32, i32
  }
  func.func @transform_2(%arg0: i32) -> (i32, i32, i32) {
    %c0_i32 = arith.constant 0 : i32
    %c0_i32_0 = arith.constant 0 : i32
    %c0_i32_1 = arith.constant 0 : i32
    return %arg0, %c0_i32, %c0_i32_0 : i32, i32, i32
  }
  func.func @transform_3(%arg0: i32) -> (i32, i32, i32) {
    %c0_i32 = arith.constant 0 : i32
    %c0_i32_0 = arith.constant 0 : i32
    %c0_i32_1 = arith.constant 0 : i32
    return %arg0, %c0_i32, %c0_i32_0 : i32, i32, i32
  }
}

</mosaic_0001>

<bundles_post_ra>
// kernel: cumulative_instance_norm_2d.1
= control target key start
LH: loop header
LB: loop body
LE: loop exit
PB: predicated region body
PF: predicated region fallthrough
CT: control target
= control target key end

     0   :  { %8 = vsyncpa [#allocation3], 0  ;;  %s1949_s0 = inlined_call_operand.hbm [shape: f32[8,16,16], index: 0, kind: input, shape index: {}]   ;;  %s1950_s1 = inlined_call_operand.vmem [shape: f32[8,1,16], index: 1, kind: input, shape index: {}]   ;;  %s1951_s2 = inlined_call_operand.vmem [shape: f32[8,1,16], index: 2, kind: input, shape index: {}]   ;;  %s1952_s3 = inlined_call_operand.hbm [shape: f32[8,16,16], index: 3, kind: output, shape index: {}]  }
   0x1   :  { %9 = vsyncpa [#allocation4], 0  ;;  %s14_s14 = sshll.u32 %s1949_s0, 4  ;;  %s1349_s15 = smov [#allocation2]   ;;  %s15_s14 = int_to_ptr.hbm [resolvable:$true] %s14_s14 }
   0x2   :  { %s16_s16 = sshll.u32 %s1349_s15, 4  ;;  %s1350_s17 = smov 128   ;;  %s17_s16 = int_to_ptr.vmem [resolvable:$true] %s16_s16 }
   0x3   :  { %s1351_s18 = smov 8  }
   0x4   :  { %22 = dma.hbm_to_vmem [thread:$0]  %s15_s14, 2048, %s17_s16, [#allocation3], %s1350_s17, %s1350_s17, %s1351_s18  }
   0x5   :  { %1345 = dma.done.wait [#allocation3], 2048  }
   0x6   :  { %1346 = vsyncadd [#allocation3], 4294965248  ;;  %vm47_vm0 = vcmask 130048   ;;  %v36_v0 = vld [vmem:[#allocation2 + $0x28] sm:$0xff]  ;;  %v35_v1 = vld [vmem:[#allocation2 + $0x20] sm:$0xff]  ;;  %s1175_s26 = sshll.u32 %s1952_s3, 4  ;;  %s1176_s26 = int_to_ptr.hbm [resolvable:$true] %s1175_s26 }
   0x7   :  { %v32_v2 = vld [vmem:[#allocation2 + $0x8] sm:$0xff]  ;;  %v63_v3 = vsel %vm47_vm0, %v36_v0, 0.0  ;;  %v60_v4 = vsel %vm47_vm0, %v35_v1, 0.0  ;;  %v38_v6 = vld [vmem:[#allocation2 + $0x38] sm:$0xff]  ;;  %v37_v7 = vld [vmem:[#allocation2 + $0x30] sm:$0xff]  ;;  %v101_v30 = vmul.f32 %v36_v0, %v36_v0  ;;  %v100_v37 = vmul.f32 %v35_v1, %v35_v1 }
   0x8   :  { %v51_v5 = vsel %vm47_vm0, %v32_v2, 0.0  ;;  %64 = vadd.xlane.f32.xlu0 %v63_v3  ;;  %61 = vadd.xlane.f32.xlu1 %v60_v4  ;;  %v69_v8 = vsel %vm47_vm0, %v38_v6, 0.0  ;;  %v66_v9 = vsel %vm47_vm0, %v37_v7, 0.0  ;;  %v34_v10 = vld [vmem:[#allocation2 + $0x18] sm:$0xff]  ;;  %v33_v12 = vld [vmem:[#allocation2 + $0x10] sm:$0xff]  ;;  %v31_v13 = vld [vmem:[#allocation2] sm:$0xff]  ;;  %v103_v31 = vmul.f32 %v38_v6, %v38_v6 }
   0x9   :  { %52 = vadd.xlane.f32.xlu2 %v51_v5  ;;  %v57_v11 = vsel %vm47_vm0, %v34_v10, 0.0  ;;  %v44_v14 = vld [vmem:[#allocation2 + $0x68] sm:$0xff]  ;;  %v54_v15 = vsel %vm47_vm0, %v33_v12, 0.0  ;;  %v48_v16 = vsel %vm47_vm0, %v31_v13, 0.0  ;;  %v43_v18 = vld [vmem:[#allocation2 + $0x60] sm:$0xff]  ;;  %v46_v19 = vld [vmem:[#allocation2 + $0x78] sm:$0xff]  ;;  %v102_v36 = vmul.f32 %v37_v7, %v37_v7 }
   0xa   :  { %v87_v17 = vsel %vm47_vm0, %v44_v14, 0.0  ;;  %v45_v20 = vld [vmem:[#allocation2 + $0x70] sm:$0xff]  ;;  %v84_v21 = vsel %vm47_vm0, %v43_v18, 0.0  ;;  %v93_v22 = vsel %vm47_vm0, %v46_v19, 0.0  ;;  %v42_v24 = vld [vmem:[#allocation2 + $0x58] sm:$0xff]  ;;  %v40_v25 = vld [vmem:[#allocation2 + $0x48] sm:$0xff]  ;;  %v97_v38 = vmul.f32 %v32_v2, %v32_v2 }
   0xb   :  { %v90_v23 = vsel %vm47_vm0, %v45_v20, 0.0  ;;  %v39_v26 = vld [vmem:[#allocation2 + $0x40] sm:$0xff]  ;;  %v81_v27 = vsel %vm47_vm0, %v42_v24, 0.0  ;;  %v75_v28 = vsel %vm47_vm0, %v40_v25, 0.0  ;;  %v41_v32 = vld [vmem:[#allocation2 + $0x50] sm:$0xff]  ;;  %v127_v33 = vsel %vm47_vm0, %v101_v30, 0.0 }
   0xc   :  { %v72_v29 = vsel %vm47_vm0, %v39_v26, 0.0  ;;  %v78_v34 = vsel %vm47_vm0, %v41_v32, 0.0  ;;  %v133_v35 = vsel %vm47_vm0, %v103_v31, 0.0  ;;  %v130_v39 = vsel %vm47_vm0, %v102_v36, 0.0 }
   0xd   :  { %v124_v40 = vsel %vm47_vm0, %v100_v37, 0.0  ;;  %v115_v41 = vsel %vm47_vm0, %v97_v38, 0.0  ;;  %v96_v42 = vmul.f32 %v31_v13, %v31_v13  ;;  %v99_v43 = vmul.f32 %v34_v10, %v34_v10 }
   0xe   :  { %v98_v44 = vmul.f32 %v33_v12, %v33_v12  ;;  %v111_v48 = vmul.f32 %v46_v19, %v46_v19  ;;  %v109_v49 = vmul.f32 %v44_v14, %v44_v14  ;;  %v108_v50 = vmul.f32 %v43_v18, %v43_v18 }
   0xf   :  { %v112_v45 = vsel %vm47_vm0, %v96_v42, 0.0  ;;  %v121_v46 = vsel %vm47_vm0, %v99_v43, 0.0  ;;  %v105_v54 = vmul.f32 %v40_v25, %v40_v25  ;;  %v110_v55 = vmul.f32 %v45_v20, %v45_v20 }
  0x10   :  { %70 = vadd.xlane.f32.xlu0 %v69_v8  ;;  %67 = vadd.xlane.f32.xlu1 %v66_v9  ;;  %v118_v47 = vsel %vm47_vm0, %v98_v44, 0.0  ;;  %v157_v51 = vsel %vm47_vm0, %v111_v48, 0.0  ;;  %v151_v52 = vsel %vm47_vm0, %v109_v49, 0.0  ;;  %v148_v53 = vsel %vm47_vm0, %v108_v50, 0.0 }
  0x11   :  { %58 = vadd.xlane.f32.xlu2 %v57_v11  ;;  %v107_v56 = vmul.f32 %v42_v24, %v42_v24  ;;  %v139_v57 = vsel %vm47_vm0, %v105_v54, 0.0  ;;  %v154_v58 = vsel %vm47_vm0, %v110_v55, 0.0  ;;  %v106_v60 = vmul.f32 %v41_v32, %v41_v32 }
  0x12   :  { %v104_v61 = vmul.f32 %v39_v26, %v39_v26  ;;  %v160_v0 = vlaneseq  ;;  %v1352_v6 = vmov 0.0   ;;  %v1353_v44 = vmov 0  }
  0x13   :  { %v145_v59 = vsel %vm47_vm0, %v107_v56, 0.0  ;;  %v142_v62 = vsel %vm47_vm0, %v106_v60, 0.0  ;;  %1227 = vset.pattern.permute.xlu1 %v1353_v44  ;;  %1226 = vset.pattern.permute.xlu2 %v1353_v44 }
  0x14   :  { %v136_v63 = vsel %vm47_vm0, %v104_v61, 0.0  ;;  %v1413_v1 = vshrl.u32 %v160_v0, 7  ;;  %v164_v2 = vand.u32 127, %v160_v0  ;;  %1228 = vset.pattern.permute.xlu0 %v1353_v44 }
  0x16   :  { %vm165_vm1 = vcmp.le.s32.totalorder %v164_v2, %v1413_v1  ;;  %v1419_v8 = vadd.s32 8, %v1413_v1 }
  0x17   :  { %v1416_v7 = vsel %vm165_vm1, 1.0, %v1352_v6 }
  0x18   :  { %55 = vadd.xlane.f32.xlu1 %v54_v15  ;;  %49 = vadd.xlane.f32.xlu0 %v48_v16  ;;  %vm166_vm2 = vcmp.le.s32.totalorder %v164_v2, %v1419_v8 }
  0x19   :  { %88 = vadd.xlane.f32.xlu2 %v87_v17  ;;  %v1424_v12 = vsel %vm166_vm2, 1.0, %v1352_v6 }
  0x20   :  { %85 = vadd.xlane.f32.xlu1 %v84_v21  ;;  %94 = vadd.xlane.f32.xlu0 %v93_v22 }
  0x21   :  { %91 = vadd.xlane.f32.xlu2 %v90_v23 }
  0x28   :  { %82 = vadd.xlane.f32.xlu1 %v81_v27  ;;  %76 = vadd.xlane.f32.xlu0 %v75_v28 }
  0x29   :  { %73 = vadd.xlane.f32.xlu2 %v72_v29 }
  0x30   :  { %128 = vadd.xlane.f32.xlu1 %v127_v33  ;;  %79 = vadd.xlane.f32.xlu0 %v78_v34 }
  0x31   :  { %134 = vadd.xlane.f32.xlu2 %v133_v35 }
  0x38   :  { %131 = vadd.xlane.f32.xlu1 %v130_v39  ;;  %125 = vadd.xlane.f32.xlu0 %v124_v40  ;;  %v543_v39 = vcvt.s32.f32 %v1413_v1 }
  0x39   :  { %116 = vadd.xlane.f32.xlu2 %v115_v41  ;;  %v544_v41 = vcvt.s32.f32 %v1419_v8 }
  0x3a   :  { %v545_v40 = vadd.f32 1.0, %v543_v39 }
  0x3b   :  { %v546_v43 = vadd.f32 1.0, %v544_v41 }
  0x3c   :  { %v547_v42 = vmul.f32 16.0, %v545_v40 }
  0x3e   :  { %1245 = vrcp.f32 %v547_v42  ;;  %vm554_vm3 = vweird.f32 %v547_v42  ;;  %v558_v55 = vand.u32 2147483647, %v547_v42 }
  0x40   :  { %113 = vadd.xlane.f32.xlu1 %v112_v45  ;;  %122 = vadd.xlane.f32.xlu0 %v121_v46  ;;  %v548_v45 = vmul.f32 16.0, %v546_v43  ;;  %vm559_vm6 = vcmp.eq.f32.partialorder %v558_v55, 8.507059e+37 }
  0x41   :  { %119 = vadd.xlane.f32.xlu2 %v118_v47 }
  0x42   :  { %1247 = vrcp.f32 %v548_v45  ;;  %vm568_vm7 = vweird.f32 %v548_v45  ;;  %v574_v60 = vand.u32 2147483648, %v548_v45 }
  0x44   :  { %v1246_v46 = vpop.eup %1245 }
  0x45   :  { %v550_v47 = vmul.f32 %v1246_v46, %v547_v42  ;;  %vm555_vm4 = vweird.f32 %v1246_v46 }
  0x46   :  { %vm556_vm5 = vmor %vm554_vm3, %vm555_vm4 }
  0x47   :  { %v551_v49 = vsub.f32 1.0, %v550_v47 }
  0x48   :  { %158 = vadd.xlane.f32.xlu1 %v157_v51  ;;  %152 = vadd.xlane.f32.xlu0 %v151_v52  ;;  %v1248_v48 = vpop.eup %1247  ;;  %v560_v52 = vand.u32 2147483648, %v547_v42 }
  0x49   :  { %149 = vadd.xlane.f32.xlu2 %v148_v53  ;;  %v564_v50 = vmul.f32 %v1248_v48, %v548_v45  ;;  %v552_v51 = vmul.f32 %v1246_v46, %v551_v49  ;;  %vm569_vm8 = vweird.f32 %v1248_v48 }
  0x4a   :  { %v561_v56 = vor.u32 1.1754944e-38, %v560_v52  ;;  %vm570_vm9 = vmor %vm568_vm7, %vm569_vm8 }
  0x4b   :  { %v565_v53 = vsub.f32 1.0, %v564_v50  ;;  %v553_v54 = vadd.f32 %v1246_v46, %v552_v51 }
  0x50   :  { %140 = vadd.xlane.f32.xlu1 %v139_v57  ;;  %155 = vadd.xlane.f32.xlu0 %v154_v58  ;;  %v566_v57 = vmul.f32 %v1248_v48, %v565_v53  ;;  %v557_v58 = vsel %vm556_vm5, %v1246_v46, %v553_v54 }
  0x51   :  { %146 = vadd.xlane.f32.xlu2 %v145_v59  ;;  %v1490_v61 = vsel %vm559_vm6, %v561_v56, %v557_v58 }
  0x58   :  { %143 = vadd.xlane.f32.xlu1 %v142_v62  ;;  %137 = vadd.xlane.f32.xlu0 %v136_v63  ;;  %v567_v62 = vadd.f32 %v1248_v48, %v566_v57  ;;  %v572_v63 = vand.u32 2147483647, %v548_v45 }
  0x5a   :  { %v571_v6 = vsel %vm570_vm9, %v1248_v48, %v567_v62  ;;  %vm573_vm10 = vcmp.eq.f32.partialorder %v572_v63, 8.507059e+37 }
  0x7b   :  { %v65_v3 = vpop.xlane.xlu0 %64  ;;  %v62_v4 = vpop.xlane.xlu1 %61 }
  0x7c   :  { %v53_v5 = vpop.xlane.xlu2 %52  ;;  %235 = vmatpush.msra.mxu2 %v65_v3 }
  0x7d   :  { %189 = vmatpush.msra.mxu0 %v53_v5 }
  0x7e   :  { %236 = vmatpush.msra.mxu2 %v62_v4  ;;  %v575_v4 = vor.u32 1.1754944e-38, %v574_v60 }
  0x7f   :  { %1192 = vmatmul.msk.f32.vlgmr.msra.gmra.mxu2 %vm47_vm0, %v1416_v7 }
  0x80   :  { %v1494_v8 = vsel %vm573_vm10, %v575_v4, %v571_v6 }
  0x83   :  { %v71_v9 = vpop.xlane.xlu0 %70  ;;  %v68_v10 = vpop.xlane.xlu1 %67 }
  0x84   :  { %v59_v11 = vpop.xlane.xlu2 %58  ;;  %258 = vmatpush.msra.mxu3 %v71_v9 }
  0x85   :  { %212 = vmatpush.msra.mxu1 %v59_v11 }
  0x86   :  { %259 = vmatpush.msra.mxu3 %v68_v10 }
  0x87   :  { %1194 = vmatmul.msk.f32.vlgmr.msra.gmra.mxu3 %vm47_vm0, %v1416_v7  ;;  %1193 = vmatmul.msk.f32.gmra.mxu2 %vm47_vm0, %v1424_v12 }
  0x8b   :  { %v56_v13 = vpop.xlane.xlu1 %55  ;;  %v50_v14 = vpop.xlane.xlu0 %49 }
  0x8c   :  { %v89_v15 = vpop.xlane.xlu2 %88  ;;  %190 = vmatpush.msra.mxu0 %v50_v14  ;;  %213 = vmatpush.msra.mxu1 %v56_v13 }
  0x8d   :  { %327 = vmatpush.msrb.mxu2 %v89_v15  ;;  %1188 = vmatmul.msk.f32.vlgmr.msra.gmra.mxu0 %vm47_vm0, %v1416_v7 }
  0x8e   :  { %1190 = vmatmul.msk.f32.vlgmr.msra.gmra.mxu1 %vm47_vm0, %v1416_v7 }
  0x8f   :  { %1195 = vmatmul.msk.f32.gmra.mxu3 %vm47_vm0, %v1424_v12 }
  0x93   :  { %v86_v16 = vpop.xlane.xlu1 %85  ;;  %v95_v17 = vpop.xlane.xlu0 %94 }
  0x94   :  { %v92_v18 = vpop.xlane.xlu2 %91  ;;  %328 = vmatpush.msrb.mxu2 %v86_v16  ;;  %350 = vmatpush.msrb.mxu3 %v95_v17 }
  0x95   :  { %1189 = vmatmul.msk.f32.gmra.mxu0 %vm47_vm0, %v1424_v12  ;;  %1200 = vmatmul.msk.f32.vlgmr.msrb.gmra.mxu2 %vm47_vm0, %v1416_v7 }
  0x96   :  { %351 = vmatpush.msrb.mxu3 %v92_v18  ;;  %1191 = vmatmul.msk.f32.gmra.mxu1 %vm47_vm0, %v1424_v12 }
  0x97   :  { %1202 = vmatmul.msk.f32.vlgmr.msrb.gmra.mxu3 %vm47_vm0, %v1416_v7 }
  0x9b   :  { %v83_v19 = vpop.xlane.xlu1 %82  ;;  %v77_v20 = vpop.xlane.xlu0 %76 }
  0x9c   :  { %v74_v21 = vpop.xlane.xlu2 %73  ;;  %281 = vmatpush.msrb.mxu0 %v77_v20  ;;  %304 = vmatpush.msrb.mxu1 %v83_v19 }
  0x9d   :  { %1201 = vmatmul.msk.f32.gmra.mxu2 %vm47_vm0, %v1424_v12 }
  0x9e   :  { %282 = vmatpush.msrb.mxu0 %v74_v21 }
  0x9f   :  { %1196 = vmatmul.msk.f32.vlgmr.msrb.gmra.mxu0 %vm47_vm0, %v1416_v7  ;;  %1203 = vmatmul.msk.f32.gmra.mxu3 %vm47_vm0, %v1424_v12 }
  0xa3   :  { %v129_v22 = vpop.xlane.xlu1 %128  ;;  %v80_v23 = vpop.xlane.xlu0 %79 }
  0xa4   :  { %v135_v24 = vpop.xlane.xlu2 %134  ;;  %305 = vmatpush.msrb.mxu1 %v80_v23  ;;  %419 = vmatpush.msra.mxu2 %v129_v22 }
  0xa5   :  { %442 = vmatpush.msra.mxu3 %v135_v24  ;;  %1198 = vmatmul.msk.f32.vlgmr.msrb.gmra.mxu1 %vm47_vm0, %v1416_v7 }
  0xa7   :  { %1197 = vmatmul.msk.f32.gmra.mxu0 %vm47_vm0, %v1424_v12 }
  0xab   :  { %v132_v25 = vpop.xlane.xlu1 %131  ;;  %v126_v26 = vpop.xlane.xlu0 %125 }
  0xac   :  { %v117_v27 = vpop.xlane.xlu2 %116  ;;  %420 = vmatpush.msra.mxu2 %v126_v26  ;;  %443 = vmatpush.msra.mxu3 %v132_v25 }
  0xad   :  { %373 = vmatpush.msra.mxu0 %v117_v27  ;;  %1208 = vmatmul.msk.f32.vlgmr.msra.gmra.mxu2 %vm47_vm0, %v1416_v7 }
  0xae   :  { %1210 = vmatmul.msk.f32.vlgmr.msra.gmra.mxu3 %vm47_vm0, %v1416_v7  ;;  %1199 = vmatmul.msk.f32.gmra.mxu1 %vm47_vm0, %v1424_v12 }
  0xb3   :  { %v114_v28 = vpop.xlane.xlu1 %113  ;;  %v123_v29 = vpop.xlane.xlu0 %122 }
  0xb4   :  { %374 = vmatpush.msra.mxu0 %v114_v28  ;;  %396 = vmatpush.msra.mxu1 %v123_v29  ;;  %v120_v30 = vpop.xlane.xlu2 %119 }
  0xb5   :  { %1204 = vmatmul.msk.f32.vlgmr.msra.gmra.mxu0 %vm47_vm0, %v1416_v7  ;;  %1209 = vmatmul.msk.f32.gmra.mxu2 %vm47_vm0, %v1424_v12 }
  0xb6   :  { %1211 = vmatmul.msk.f32.gmra.mxu3 %vm47_vm0, %v1424_v12  ;;  %397 = vmatpush.msra.mxu1 %v120_v30 }
  0xb7   :  { %1206 = vmatmul.msk.f32.vlgmr.msra.gmra.mxu1 %vm47_vm0, %v1416_v7 }
  0xbb   :  { %v159_v31 = vpop.xlane.xlu1 %158  ;;  %v153_v32 = vpop.xlane.xlu0 %152 }
  0xbc   :  { %511 = vmatpush.msrb.mxu2 %v153_v32  ;;  %534 = vmatpush.msrb.mxu3 %v159_v31  ;;  %v150_v33 = vpop.xlane.xlu2 %149 }
  0xbd   :  { %1205 = vmatmul.msk.f32.gmra.mxu0 %vm47_vm0, %v1424_v12 }
  0xbe   :  { %512 = vmatpush.msrb.mxu2 %v150_v33 }
  0xbf   :  { %1207 = vmatmul.msk.f32.gmra.mxu1 %vm47_vm0, %v1424_v12  ;;  %1216 = vmatmul.msk.f32.vlgmr.msrb.gmra.mxu2 %vm47_vm0, %v1416_v7 }
  0xc3   :  { %v141_v34 = vpop.xlane.xlu1 %140  ;;  %v156_v35 = vpop.xlane.xlu0 %155 }
  0xc4   :  { %465 = vmatpush.msrb.mxu0 %v141_v34  ;;  %535 = vmatpush.msrb.mxu3 %v156_v35  ;;  %v147_v36 = vpop.xlane.xlu2 %146 }
  0xc5   :  { %1218 = vmatmul.msk.f32.vlgmr.msrb.gmra.mxu3 %vm47_vm0, %v1416_v7  ;;  %488 = vmatpush.msrb.mxu1 %v147_v36 }
  0xc7   :  { %1217 = vmatmul.msk.f32.gmra.mxu2 %vm47_vm0, %v1424_v12 }
  0xcb   :  { %v144_v37 = vpop.xlane.xlu1 %143  ;;  %v138_v38 = vpop.xlane.xlu0 %137 }
  0xcc   :  { %466 = vmatpush.msrb.mxu0 %v138_v38  ;;  %489 = vmatpush.msrb.mxu1 %v144_v37 }
  0xcd   :  { %1212 = vmatmul.msk.f32.vlgmr.msrb.gmra.mxu0 %vm47_vm0, %v1416_v7  ;;  %1214 = vmatmul.msk.f32.vlgmr.msrb.gmra.mxu1 %vm47_vm0, %v1416_v7 }
  0xce   :  { %1219 = vmatmul.msk.f32.gmra.mxu3 %vm47_vm0, %v1424_v12 }
  0xd5   :  { %1213 = vmatmul.msk.f32.gmra.mxu0 %vm47_vm0, %v1424_v12  ;;  %1215 = vmatmul.msk.f32.gmra.mxu1 %vm47_vm0, %v1424_v12 }
 0x102   :  { %v238_v59 = vpop.f32.mrf.mxu2 }
 0x103   :  { %v581_v9 = vmul.f32 %v1490_v61, %v238_v59 }
 0x105   :  { %v597_v27 = vmul.f32 2.0, %v581_v9  ;;  %v661_v37 = vmul.f32 %v581_v9, %v581_v9 }
 0x107   :  { %v613_v36 = vmul.f32 %v597_v27, %v238_v59 }
 0x10a   :  { %v192_v0 = vpop.f32.mrf.mxu0  ;;  %v261_v1 = vpop.f32.mrf.mxu3 }
 0x10b   :  { %v577_v2 = vmul.f32 %v1490_v61, %v192_v0  ;;  %v215_v3 = vpop.f32.mrf.mxu1  ;;  %v241_v7 = vpop.f32.mrf.mxu2  ;;  %v583_v16 = vmul.f32 %v1490_v61, %v261_v1 }
 0x10c   :  { %v579_v5 = vmul.f32 %v1490_v61, %v215_v3  ;;  %v582_v10 = vmul.f32 %v1494_v8, %v241_v7 }
 0x10d   :  { %867 = vperm.xlu2 %1226, %v577_v2   ;;  %v593_v30 = vmul.f32 2.0, %v577_v2  ;;  %v599_v31 = vmul.f32 2.0, %v583_v16  ;;  %v657_v39 = vmul.f32 %v577_v2, %v577_v2  ;;  %v663_v40 = vmul.f32 %v583_v16, %v583_v16 }
 0x10e   :  { %877 = vperm.xlu1 %1227, %v579_v5   ;;  %v595_v34 = vmul.f32 2.0, %v579_v5  ;;  %v598_v35 = vmul.f32 2.0, %v582_v10  ;;  %v659_v44 = vmul.f32 %v579_v5, %v579_v5  ;;  %v1535_v46 = vmul.f32 %v582_v10, %v582_v10 }
 0x10f   :  { %v609_v43 = vmul.f32 %v593_v30, %v192_v0  ;;  %v615_v45 = vmul.f32 %v599_v31, %v261_v1 }
 0x110   :  { %v611_v47 = vmul.f32 %v595_v34, %v215_v3  ;;  %v614_v48 = vmul.f32 %v598_v35, %v241_v7 }
 0x112   :  { %v195_v11 = vpop.f32.mrf.mxu0  ;;  %v264_v12 = vpop.f32.mrf.mxu3 }
 0x113   :  { %v578_v13 = vmul.f32 %v1494_v8, %v195_v11  ;;  %v218_v14 = vpop.f32.mrf.mxu1  ;;  %v584_v15 = vmul.f32 %v1494_v8, %v264_v12 }
 0x114   :  { %v580_v22 = vmul.f32 %v1494_v8, %v218_v14 }
 0x115   :  { %887 = vperm.xlu2 %1226, %v581_v9   ;;  %872 = vperm.xlu0 %1228, %v578_v13   ;;  %v600_v41 = vmul.f32 2.0, %v584_v15  ;;  %v594_v42 = vmul.f32 2.0, %v578_v13  ;;  %v1538_v52 = vmul.f32 %v584_v15, %v584_v15  ;;  %v1540_v53 = vmul.f32 %v578_v13, %v578_v13 }
 0x116   :  { %892 = vperm.xlu1 %1227, %v582_v10   ;;  %v596_v49 = vmul.f32 2.0, %v580_v22  ;;  %v1542_v54 = vmul.f32 %v580_v22, %v580_v22 }
 0x117   :  { %v616_v57 = vmul.f32 %v600_v41, %v264_v12  ;;  %v610_v58 = vmul.f32 %v594_v42, %v195_v11 }
 0x118   :  { %v330_v17 = vpop.f32.mrf.mxu2  ;;  %v612_v3 = vmul.f32 %v596_v49, %v218_v14 }
 0x119   :  { %v589_v32 = vmul.f32 %v1490_v61, %v330_v17 }
 0x11a   :  { %v1503_v19 = vpop.f32.mrf.mxu3 }
 0x11b   :  { %v591_v24 = vmul.f32 %v1490_v61, %v1503_v19  ;;  %v605_v50 = vmul.f32 2.0, %v589_v32  ;;  %v1550_v5 = vmul.f32 %v589_v32, %v589_v32 }
 0x11c   :  { %v1501_v18 = vpop.f32.mrf.mxu0 }
 0x11d   :  { %897 = vperm.xlu2 %1226, %v583_v16   ;;  %v1507_v20 = vmul.f32 %v1490_v61, %v1501_v18  ;;  %v607_v59 = vmul.f32 2.0, %v591_v24  ;;  %v1548_v4 = vmul.f32 %v605_v50, %v330_v17  ;;  %v1553_v9 = vmul.f32 %v591_v24, %v591_v24 }
 0x11e   :  { %902 = vperm.xlu1 %1227, %v584_v15  }
 0x11f   :  { %907 = vperm.xlu0 %1228, %v1507_v20   ;;  %v601_v63 = vmul.f32 2.0, %v1507_v20  ;;  %v1557_v13 = vmul.f32 %v607_v59, %v1503_v19  ;;  %v1561_v14 = vmul.f32 %v1507_v20, %v1507_v20 }
 0x120   :  { %v1520_v25 = vpop.f32.mrf.mxu2 }
 0x121   :  { %v590_v28 = vmul.f32 %v1494_v8, %v1520_v25  ;;  %v1566_v17 = vmul.f32 %v601_v63, %v1501_v18 }
 0x122   :  { %v1510_v21 = vpop.f32.mrf.mxu1  ;;  %v1522_v26 = vpop.f32.mrf.mxu3 }
 0x123   :  { %v1515_v23 = vmul.f32 %v1490_v61, %v1510_v21  ;;  %v592_v15 = vmul.f32 %v1494_v8, %v1522_v26  ;;  %v606_v19 = vmul.f32 2.0, %v590_v28  ;;  %v1572_v31 = vmul.f32 %v590_v28, %v590_v28 }
 0x124   :  { %v1526_v29 = vpop.f32.mrf.mxu0 }
 0x125   :  { %882 = vperm.xlu2 %1226, %v580_v22   ;;  %v586_v0 = vmul.f32 %v1494_v8, %v1526_v29  ;;  %v603_v30 = vmul.f32 2.0, %v1515_v23 }
 0x126   :  { %917 = vperm.xlu1 %1227, %v1515_v23  }
 0x127   :  { %937 = vperm.xlu0 %1228, %v591_v24   ;;  %v1607_v59 = vmul.f32 %v586_v0, %v586_v0 }
 0x12b   :  { %v1529_v33 = vpop.f32.mrf.mxu1 }
 0x12c   :  { %v1533_v38 = vmul.f32 %v1494_v8, %v1529_v33 }
 0x12d   :  { %927 = vperm.xlu2 %1226, %v589_v32  }
 0x12e   :  { %932 = vperm.xlu1 %1227, %v590_v28  }
 0x12f   :  { %922 = vperm.xlu0 %1228, %v1533_v38  }
 0x130   :  { %v422_v51 = vpop.f32.mrf.mxu2 }
 0x131   :  { %v629_v55 = vsub.f32 %v422_v51, %v613_v36  ;;  %v445_v56 = vpop.f32.mrf.mxu3 }
 0x132   :  { %v631_v60 = vsub.f32 %v445_v56, %v615_v45  ;;  %v376_v62 = vpop.f32.mrf.mxu0  ;;  %v1591_v45 = vmul.f32 %v592_v15, %v592_v15  ;;  %v604_v56 = vmul.f32 2.0, %v1533_v38 }
 0x133   :  { %v645_v1 = vmul.f32 %v629_v55, %v1490_v61  ;;  %v625_v2 = vsub.f32 %v376_v62, %v609_v43  ;;  %v1598_v55 = vmul.f32 %v603_v30, %v1510_v21 }
 0x134   :  { %v647_v6 = vmul.f32 %v631_v60, %v1490_v61  ;;  %v399_v7 = vpop.f32.mrf.mxu1 }
 0x135   :  { %v677_v10 = vadd.f32 %v661_v37, %v645_v1  ;;  %v641_v11 = vmul.f32 %v625_v2, %v1490_v61  ;;  %v627_v12 = vsub.f32 %v399_v7, %v611_v47  ;;  %912 = vperm.xlu2 %1226, %v586_v0   ;;  %v1581_v37 = vmul.f32 %v1515_v23, %v1515_v23 }
 0x136   :  { %v679_v16 = vadd.f32 %v663_v40, %v647_v6  ;;  %v602_v47 = vmul.f32 2.0, %v586_v0 }
 0x137   :  { %v1568_v22 = vadd.f32 1e-05, %v677_v10  ;;  %v673_v24 = vadd.f32 %v657_v39, %v641_v11  ;;  %v643_v27 = vmul.f32 %v627_v12, %v1490_v61  ;;  %v608_v39 = vmul.f32 2.0, %v592_v15 }
 0x138   :  { %v1574_v32 = vadd.f32 1e-05, %v679_v16  ;;  %v425_v20 = vpop.f32.mrf.mxu2  ;;  %v1616_v21 = vmul.f32 %v602_v47, %v1526_v29 }
 0x139   :  { %1249 = vrsqrt.f32 %v1568_v22  ;;  %v1577_v34 = vadd.f32 1e-05, %v673_v24  ;;  %v675_v35 = vadd.f32 %v659_v44, %v643_v27  ;;  %v630_v18 = vsub.f32 %v425_v20, %v614_v48  ;;  %v448_v36 = vpop.f32.mrf.mxu3 }
 0x13a   :  { %1251 = vrsqrt.f32 %v1574_v32  ;;  %v632_v40 = vsub.f32 %v448_v36, %v616_v57  ;;  %v379_v28 = vpop.f32.mrf.mxu0  ;;  %v1589_v44 = vmul.f32 %v606_v19, %v1520_v25  ;;  %v1601_v25 = vmul.f32 %v608_v39, %v1522_v26 }
 0x13b   :  { %1253 = vrsqrt.f32 %v1577_v34  ;;  %v1585_v41 = vadd.f32 1e-05, %v675_v35  ;;  %v646_v42 = vmul.f32 %v630_v18, %v1494_v8  ;;  %v626_v43 = vsub.f32 %v379_v28, %v610_v58 }
 0x13c   :  { %v648_v23 = vmul.f32 %v632_v40, %v1494_v8  ;;  %v402_v48 = vpop.f32.mrf.mxu1  ;;  %v1620_v26 = vmul.f32 %v1533_v38, %v1533_v38  ;;  %vm751_vm11 = vweird.f32 %v1568_v22  ;;  %vm711_vm12 = vweird.f32 %v1577_v34 }
 0x13d   :  { %1255 = vrsqrt.f32 %v1585_v41  ;;  %v678_v49 = vadd.f32 %v1535_v46, %v646_v42  ;;  %v642_v50 = vmul.f32 %v626_v43, %v1494_v8  ;;  %v628_v51 = vsub.f32 %v402_v48, %v612_v3  ;;  %942 = vperm.xlu2 %1226, %v592_v15  }
 0x13e   :  { %v680_v57 = vadd.f32 %v1538_v52, %v648_v23  ;;  %v1635_v3 = vmul.f32 %v604_v56, %v1529_v33  ;;  %vm771_vm13 = vweird.f32 %v1574_v32  ;;  %vm731_vm1 = vweird.f32 %v1585_v41 }
 0x13f   :  { %v1605_v58 = vpop.eup %1249  ;;  %v1609_v60 = vadd.f32 1e-05, %v678_v49  ;;  %v674_v46 = vadd.f32 %v1540_v53, %v642_v50  ;;  %v644_v62 = vmul.f32 %v628_v51, %v1494_v8 }
 0x140   :  { %v1613_v63 = vpop.eup %1251  ;;  %v746_v52 = vmul.f32 %v1605_v58, %v1568_v22  ;;  %v1624_v0 = vadd.f32 1e-05, %v680_v57  ;;  %vm752_vm14 = vweird.f32 %v1605_v58 }
 0x141   :  { %v1626_v1 = vpop.eup %1253  ;;  %v766_v53 = vmul.f32 %v1613_v63, %v1574_v32  ;;  %1257 = vrsqrt.f32 %v1609_v60  ;;  %v1631_v2 = vadd.f32 1e-05, %v674_v46  ;;  %v676_v29 = vadd.f32 %v1542_v54, %v644_v62  ;;  %vm753_vm3 = vmor %vm751_vm11, %vm752_vm14 }
 0x142   :  { %v706_v38 = vmul.f32 %v1626_v1, %v1577_v34  ;;  %1259 = vrsqrt.f32 %v1624_v0  ;;  %v514_v6 = vpop.f32.mrf.mxu2  ;;  %v747_v7 = vmul.f32 %v1605_v58, %v746_v52  ;;  %vm712_vm15 = vweird.f32 %v1626_v1 }
 0x143   :  { %v1641_v10 = vpop.eup %1255  ;;  %1261 = vrsqrt.f32 %v1631_v2  ;;  %v1644_v11 = vadd.f32 1e-05, %v676_v29  ;;  %v637_v12 = vsub.f32 %v514_v6, %v1548_v4  ;;  %v767_v54 = vmul.f32 %v1613_v63, %v766_v53  ;;  %vm713_vm5 = vmor %vm711_vm12, %vm712_vm15 }
 0x144   :  { %v726_v33 = vmul.f32 %v1641_v10, %v1585_v41  ;;  %v748_v15 = vmul.f32 0.5, %v747_v7  ;;  %v707_v16 = vmul.f32 %v1626_v1, %v706_v38  ;;  %vm732_vm2 = vweird.f32 %v1641_v10 }
 0x145   :  { %1263 = vrsqrt.f32 %v1644_v11  ;;  %v653_v24 = vmul.f32 %v637_v12, %v1490_v61  ;;  %v768_v27 = vmul.f32 0.5, %v767_v54  ;;  %vm772_vm4 = vweird.f32 %v1613_v63  ;;  %vm733_vm7 = vmor %vm731_vm1, %vm732_vm2 }
 0x146   :  { %v749_v4 = vsub.f32 1.5, %v748_v15  ;;  %v708_v30 = vmul.f32 0.5, %v707_v16  ;;  %v727_v19 = vmul.f32 %v1641_v10, %v726_v33  ;;  %vm721_vm6 = vweird.f32 %v1631_v2  ;;  %vm1716_vm9 = vmor %vm771_vm13, %vm772_vm4 }
 0x147   :  { %v1658_v20 = vpop.eup %1257  ;;  %v685_v35 = vadd.f32 %v1550_v5, %v653_v24  ;;  %v769_v18 = vsub.f32 1.5, %v768_v27  ;;  %vm761_vm8 = vweird.f32 %v1609_v60  ;;  %vm781_vm1 = vweird.f32 %v1624_v0 }
 0x148   :  { %v1663_v36 = vpop.eup %1259  ;;  %v537_v39 = vpop.f32.mrf.mxu3  ;;  %v750_v40 = vmul.f32 %v1605_v58, %v749_v4  ;;  %v709_v28 = vsub.f32 1.5, %v708_v30  ;;  %v728_v42 = vmul.f32 0.5, %v727_v19  ;;  %v756_v47 = vmul.f32 %v1658_v20, %v1609_v60 }
 0x149   :  { %v1667_v43 = vpop.eup %1261  ;;  %v1671_v5 = vadd.f32 1e-05, %v685_v35  ;;  %v639_v23 = vsub.f32 %v537_v39, %v1557_v13  ;;  %v776_v53 = vmul.f32 %v1663_v36, %v1624_v0  ;;  %vm762_vm11 = vweird.f32 %v1658_v20 }
 0x14a   :  { %v716_v48 = vmul.f32 %v1667_v43, %v1631_v2  ;;  %v468_v49 = vpop.f32.mrf.mxu0  ;;  %v491_v50 = vpop.f32.mrf.mxu1  ;;  %v754_v51 = vsel %vm753_vm3, %v1605_v58, %v750_v40  ;;  %v710_v56 = vmul.f32 %v1626_v1, %v709_v28  ;;  %v729_v57 = vsub.f32 1.5, %v728_v42  ;;  %vm763_vm13 = vmor %vm761_vm8, %vm762_vm11 }
 0x14b   :  { %v1683_v46 = vpop.eup %1263  ;;  %v655_v13 = vmul.f32 %v639_v23, %v1490_v61  ;;  %v633_v62 = vsub.f32 %v468_v49, %v1566_v17  ;;  %v635_v22 = vsub.f32 %v491_v50, %v1598_v55  ;;  %v517_v52 = vpop.f32.mrf.mxu2  ;;  %983 = vperm.xlu0 %1228, %v754_v51   ;;  %v770_v58 = vmul.f32 %v1613_v63, %v769_v18 }
 0x14c   :  { %v638_v29 = vsub.f32 %v517_v52, %v1589_v44  ;;  %v714_v38 = vsel %vm713_vm5, %v1626_v1, %v710_v56  ;;  %v730_v17 = vmul.f32 %v1641_v10, %v729_v57  ;;  %1265 = vrsqrt.f32 %v1671_v5 }
 0x14d   :  { %v687_v55 = vadd.f32 %v1553_v9, %v655_v13  ;;  %v649_v34 = vmul.f32 %v633_v62, %v1490_v61  ;;  %v651_v6 = vmul.f32 %v635_v22, %v1490_v61  ;;  %963 = vperm.xlu1 %1227, %v714_v38   ;;  %v736_v44 = vmul.f32 %v1683_v46, %v1644_v11 }
 0x14e   :  { %v654_v1 = vmul.f32 %v638_v29, %v1494_v8  ;;  %v734_v7 = vsel %vm733_vm7, %v1641_v10, %v730_v17  ;;  %v717_v9 = vmul.f32 %v1667_v43, %v716_v48  ;;  %v774_v54 = vsel %vm1716_vm9, %v1613_v63, %v770_v58 }
 0x14f   :  { %v681_v41 = vadd.f32 %v1561_v14, %v649_v34  ;;  %v683_v12 = vadd.f32 %v1581_v37, %v651_v6  ;;  %973 = vperm.xlu2 %1226, %v734_v7   ;;  %v757_v10 = vmul.f32 %v1658_v20, %v756_v47  ;;  %v1727_v33 = vadd.f32 1e-05, %v687_v55 }
 0x150   :  { %v686_v32 = vadd.f32 %v1572_v31, %v654_v1  ;;  %v718_v15 = vmul.f32 0.5, %v717_v9  ;;  %v777_v16 = vmul.f32 %v1663_v36, %v776_v53  ;;  %vm722_vm10 = vweird.f32 %v1667_v43 }
 0x151   :  { %v1731_v24 = vadd.f32 1e-05, %v681_v41  ;;  %v1733_v27 = vadd.f32 1e-05, %v683_v12  ;;  %v540_v14 = vpop.f32.mrf.mxu3  ;;  %v758_v37 = vmul.f32 0.5, %v757_v10  ;;  %vm723_vm12 = vmor %vm721_vm6, %vm722_vm10  ;;  %v737_v51 = vmul.f32 %v1683_v46, %v736_v44 }
 0x152   :  { %v1736_v4 = vadd.f32 1e-05, %v686_v32  ;;  %v640_v63 = vsub.f32 %v540_v14, %v1601_v25  ;;  %v471_v30 = vpop.f32.mrf.mxu0  ;;  %v494_v19 = vpop.f32.mrf.mxu1  ;;  %v719_v35 = vsub.f32 1.5, %v718_v15  ;;  %v778_v42 = vmul.f32 0.5, %v777_v16 }
 0x153   :  { %v1740_v31 = vpop.eup %1265  ;;  %1267 = vrsqrt.f32 %v1731_v24  ;;  %v634_v18 = vsub.f32 %v471_v30, %v1616_v21  ;;  %v636_v39 = vsub.f32 %v494_v19, %v1635_v3  ;;  %v759_v40 = vsub.f32 1.5, %v758_v37 }
 0x154   :  { %1269 = vrsqrt.f32 %v1733_v27  ;;  %v656_v28 = vmul.f32 %v640_v63, %v1494_v8  ;;  %v720_v25 = vmul.f32 %v1667_v43, %v719_v35  ;;  %v738_v13 = vmul.f32 0.5, %v737_v51 }
 0x155   :  { %1271 = vrsqrt.f32 %v1736_v4  ;;  %v650_v47 = vmul.f32 %v634_v18, %v1494_v8  ;;  %v652_v23 = vmul.f32 %v636_v39, %v1494_v8  ;;  %993 = vperm.xlu1 %1227, %v774_v54   ;;  %v760_v21 = vmul.f32 %v1658_v20, %v759_v40 }
 0x156   :  { %1273 = vrsqrt.f32 %v1727_v33  ;;  %v688_v3 = vadd.f32 %v1591_v45, %v656_v28  ;;  %v724_v48 = vsel %vm723_vm12, %v1667_v43, %v720_v25  ;;  %v779_v8 = vsub.f32 1.5, %v778_v42 }
 0x157   :  { %v682_v49 = vadd.f32 %v1607_v59, %v650_v47  ;;  %v684_v50 = vadd.f32 %v1620_v26, %v652_v23  ;;  %968 = vperm.xlu0 %1228, %v724_v48   ;;  %v764_v2 = vsel %vm763_vm13, %v1658_v20, %v760_v21  ;;  %v826_v45 = vmul.f32 %v1740_v31, %v1671_v5 }
 0x158   :  { %v1769_v56 = vadd.f32 1e-05, %v688_v3  ;;  %988 = vperm.xlu2 %1226, %v764_v2   ;;  %v780_v20 = vmul.f32 %v1663_v36, %v779_v8  ;;  %vm782_vm14 = vweird.f32 %v1663_v36  ;;  %v739_v52 = vsub.f32 1.5, %v738_v13 }
 0x159   :  { %v1268_v43 = vpop.eup %1267  ;;  %v1771_v57 = vadd.f32 1e-05, %v682_v49  ;;  %v1773_v60 = vadd.f32 1e-05, %v684_v50  ;;  %vm742_vm15 = vweird.f32 %v1683_v46  ;;  %v827_v29 = vmul.f32 %v1740_v31, %v826_v45  ;;  %vm783_vm2 = vmor %vm781_vm1, %vm782_vm14 }
 0x15a   :  { %v1270_v59 = vpop.eup %1269  ;;  %v786_v26 = vmul.f32 %v1268_v43, %v1731_v24  ;;  %1275 = vrsqrt.f32 %v1769_v56  ;;  %v740_v38 = vmul.f32 %v1683_v46, %v739_v52  ;;  %vm741_vm3 = vweird.f32 %v1644_v11 }
 0x15b   :  { %v1779_v62 = vpop.eup %1271  ;;  %v806_v22 = vmul.f32 %v1270_v59, %v1733_v27  ;;  %1277 = vrsqrt.f32 %v1771_v57  ;;  %v784_v34 = vsel %vm783_vm2, %v1663_v36, %v780_v20  ;;  %vm743_vm4 = vmor %vm741_vm3, %vm742_vm15  ;;  %v828_v6 = vmul.f32 0.5, %v827_v29  ;;  %v1849_v29 = vld [vmem:[%s1950_s1 + $0x1] ss:$0 sm:$0xff] }
 0x15c   :  { %v1784_v58 = vpop.eup %1273  ;;  %v836_v53 = vmul.f32 %v1779_v62, %v1736_v4  ;;  %1279 = vrsqrt.f32 %v1773_v60  ;;  %v787_v55 = vmul.f32 %v1268_v43, %v786_v26  ;;  %v744_v1 = vsel %vm743_vm4, %v1683_v46, %v740_v38 }
 0x15d   :  { %v807_v17 = vmul.f32 %v1270_v59, %v806_v22  ;;  %v846_v9 = vmul.f32 %v1784_v58, %v1727_v33  ;;  %978 = vperm.xlu1 %1227, %v744_v1   ;;  %vm811_vm5 = vweird.f32 %v1733_v27  ;;  %vm812_vm6 = vweird.f32 %v1270_v59 }
 0x15e   :  { %v837_v44 = vmul.f32 %v1779_v62, %v836_v53  ;;  %v788_v0 = vmul.f32 0.5, %v787_v55  ;;  %v829_v11 = vsub.f32 1.5, %v828_v6  ;;  %vm832_vm7 = vweird.f32 %v1740_v31  ;;  %vm813_vm10 = vmor %vm811_vm5, %vm812_vm6 }
 0x15f   :  { %998 = vperm.xlu0 %1228, %v784_v34   ;;  %v808_v7 = vmul.f32 0.5, %v807_v17  ;;  %vm792_vm8 = vweird.f32 %v1268_v43  ;;  %vm791_vm9 = vweird.f32 %v1731_v24  ;;  %vm831_vm11 = vweird.f32 %v1671_v5  ;;  %v1854_v17 = vld [vmem:[%s1951_s2 + $0x1] ss:$0 sm:$0xff] }
 0x160   :  { %v1796_v61 = vpop.eup %1275  ;;  %v789_v12 = vsub.f32 1.5, %v788_v0  ;;  %v838_v32 = vmul.f32 0.5, %v837_v44  ;;  %v830_v14 = vmul.f32 %v1740_v31, %v829_v11  ;;  %vm793_vm12 = vmor %vm791_vm9, %vm792_vm8  ;;  %v847_v18 = vmul.f32 %v1784_v58, %v846_v9  ;;  %v1232_v11 = vld [vmem:[%s1951_s2 + $0x2] ss:$0 sm:$0xff] }
 0x161   :  { %v1278_v36 = vpop.eup %1277  ;;  %v809_v41 = vsub.f32 1.5, %v808_v7  ;;  %v856_v46 = vmul.f32 %v1796_v61, %v1769_v56  ;;  %vm833_vm13 = vmor %vm831_vm11, %vm832_vm7  ;;  %vm842_vm1 = vweird.f32 %v1779_v62  ;;  %vm801_vm2 = vweird.f32 %v1771_v57  ;;  %v1282_v7 = vld [vmem:[#allocation2 + $0x28] sm:$0xff] }
 0x162   :  { %v1280_v54 = vpop.eup %1279  ;;  %v796_v10 = vmul.f32 %v1278_v36, %v1771_v57  ;;  %v790_v37 = vmul.f32 %v1268_v43, %v789_v12  ;;  %v839_v24 = vsub.f32 1.5, %v838_v32  ;;  %v834_v27 = vsel %vm833_vm13, %v1740_v31, %v830_v14 }
 0x163   :  { %v816_v15 = vmul.f32 %v1280_v54, %v1773_v60  ;;  %v810_v16 = vmul.f32 %v1270_v59, %v809_v41  ;;  %v857_v5 = vmul.f32 %v1796_v61, %v856_v46  ;;  %vm802_vm14 = vweird.f32 %v1278_v36 }
 0x164   :  { %v797_v63 = vmul.f32 %v1278_v36, %v796_v10  ;;  %v794_v19 = vsel %vm793_vm12, %v1268_v43, %v790_v37  ;;  %vm822_vm15 = vweird.f32 %v1280_v54  ;;  %v848_v47 = vmul.f32 0.5, %v847_v18  ;;  %vm803_vm4 = vmor %vm801_vm2, %vm802_vm14  ;;  %v1283_v10 = vld [vmem:[#allocation2 + $0x20] sm:$0xff] }
 0x165   :  { %v814_v30 = vsel %vm813_vm10, %v1270_v59, %v810_v16  ;;  %v817_v35 = vmul.f32 %v1280_v54, %v816_v15  ;;  %1003 = vperm.xlu2 %1226, %v794_v19   ;;  %1023 = vperm.xlu1 %1227, %v834_v27   ;;  %v840_v23 = vmul.f32 %v1779_v62, %v839_v24  ;;  %vm821_vm3 = vweird.f32 %v1773_v60  ;;  %v1284_v16 = vld [vmem:[#allocation2] sm:$0xff] }
 0x166   :  { %v798_v39 = vmul.f32 0.5, %v797_v63  ;;  %v858_v31 = vmul.f32 0.5, %v857_v5  ;;  %vm841_vm5 = vweird.f32 %v1736_v4  ;;  %vm823_vm6 = vmor %vm821_vm3, %vm822_vm15  ;;  %v849_v49 = vsub.f32 1.5, %v848_v47  ;;  %v1233_v63 = vld [vmem:[%s1950_s1] ss:$0 sm:$0xff] }
 0x167   :  { %1013 = vperm.xlu0 %1228, %v814_v30   ;;  %v1815_v40 = vpop.permute.xlu2 %867  ;;  %v818_v28 = vmul.f32 0.5, %v817_v35  ;;  %vm843_vm7 = vmor %vm841_vm5, %vm842_vm1  ;;  %vm852_vm8 = vweird.f32 %v1784_v58  ;;  %vm851_vm9 = vweird.f32 %v1727_v33  ;;  %vm862_vm10 = vweird.f32 %v1796_v61  ;;  %v1285_v30 = vld [vmem:[#allocation2 + $0x40] sm:$0xff] }
 0x168   :  { %v799_v25 = vsub.f32 1.5, %v798_v39  ;;  %v844_v50 = vsel %vm843_vm7, %v1779_v62, %v840_v23  ;;  %v859_v51 = vsub.f32 1.5, %v858_v31  ;;  %v850_v45 = vmul.f32 %v1784_v58, %v849_v49  ;;  %vm853_vm11 = vmor %vm851_vm9, %vm852_vm8  ;;  %v1879_v18 = vld [vmem:[%s1950_s1 + $0x4] ss:$0 sm:$0xff]  ;;  %v1234_v39 = vld [vmem:[%s1951_s2] ss:$0 sm:$0xff] }
 0x169   :  { %v819_v42 = vsub.f32 1.5, %v818_v28  ;;  %vm861_vm12 = vweird.f32 %v1769_v56  ;;  %v945_v14 = vsub.f32 %v1284_v16, %v1815_v40  ;;  %v1887_v28 = vld [vmem:[%s1951_s2 + $0x4] ss:$0 sm:$0xff] }
 0x16a   :  { %v800_v21 = vmul.f32 %v1278_v36, %v799_v25  ;;  %v860_v4 = vmul.f32 %v1796_v61, %v859_v51  ;;  %v854_v43 = vsel %vm853_vm11, %v1784_v58, %v850_v45  ;;  %vm863_vm13 = vmor %vm861_vm12, %vm862_vm10  ;;  %v1281_v58 = vld [vmem:[#allocation2 + $0x10] sm:$0xff]  ;;  %v1288_v51 = vld [vmem:[#allocation2 + $0x8] sm:$0xff] }
 0x16b   :  { %v820_v3 = vmul.f32 %v1280_v54, %v819_v42 }
 0x16c   :  { %v804_v8 = vsel %vm803_vm4, %v1278_v36, %v800_v21  ;;  %v864_v57 = vsel %vm863_vm13, %v1796_v61, %v860_v4  ;;  %v1231_v61 = vld [vmem:[%s1950_s1 + $0x2] ss:$0 sm:$0xff]  ;;  %v1238_v4 = vld [vmem:[%s1951_s2 + $0x3] ss:$0 sm:$0xff] }
 0x16d   :  { %v824_v48 = vsel %vm823_vm6, %v1280_v54, %v820_v3  ;;  %1008 = vperm.xlu1 %1227, %v804_v8   ;;  %v1286_v3 = vld [vmem:[#allocation2 + $0x30] sm:$0xff]  ;;  %v1287_v8 = vld [vmem:[#allocation2 + $0x58] sm:$0xff] }
 0x16e   :  { %1018 = vperm.xlu2 %1226, %v824_v48   ;;  %v1237_v48 = vld [vmem:[%s1950_s1 + $0x3] ss:$0 sm:$0xff] }
 0x16f   :  { %1028 = vperm.xlu0 %1228, %v844_v50   ;;  %v888_v2 = vpop.permute.xlu2 %887 }
 0x170   :  { %v949_v32 = vsub.f32 %v1283_v10, %v888_v2  ;;  %v1239_v2 = vld [vmem:[%s1950_s1 + $0x5] ss:$0 sm:$0xff] }
 0x175   :  { %1038 = vperm.xlu1 %1227, %v864_v57  }
 0x176   :  { %1033 = vperm.xlu2 %1226, %v854_v43  }
 0x177   :  { %v1832_v60 = vpop.permute.xlu2 %897 }
 0x178   :  { %v951_v31 = vsub.f32 %v1286_v3, %v1832_v60  ;;  %v1240_v60 = vld [vmem:[%s1951_s2 + $0x5] ss:$0 sm:$0xff] }
 0x17f   :  { %v1834_v13 = vpop.permute.xlu2 %882 }
 0x180   :  { %v878_v33 = vpop.permute.xlu1 %877 }
 0x181   :  { %v947_v53 = vsub.f32 %v1281_v58, %v878_v33 }
 0x187   :  { %v1836_v59 = vpop.permute.xlu2 %927  ;;  %v1840_v20 = vpop.permute.xlu0 %872 }
 0x188   :  { %v893_v62 = vpop.permute.xlu1 %892  ;;  %v946_v45 = vsub.f32 %v1288_v51, %v1840_v20 }
 0x189   :  { %v950_v0 = vsub.f32 %v1282_v7, %v893_v62 }
 0x18f   :  { %v1838_v26 = vpop.permute.xlu2 %912 }
 0x190   :  { %v1844_v52 = vpop.permute.xlu1 %902 }
 0x191   :  { %v908_v56 = vpop.permute.xlu0 %907 }
 0x192   :  { %v953_v19 = vsub.f32 %v1285_v30, %v908_v56 }
 0x197   :  { %v1842_v22 = vpop.permute.xlu2 %942 }
 0x198   :  { %v1859_v44 = vpop.permute.xlu1 %917 }
 0x199   :  { %v1856_v34 = vpop.permute.xlu0 %937 }
 0x1a0   :  { %v1869_v54 = vpop.permute.xlu1 %932 }
 0x1a1   :  { %v923_v41 = vpop.permute.xlu0 %922 }
 0x1a2   :  { %v956_v49 = vsub.f32 %v1287_v8, %v923_v41 }
 0x1a9   :  { %v974_v38 = vpop.permute.xlu2 %973 }
 0x1aa   :  { %v1043_v55 = vmul.f32 %v974_v38, %v947_v53 }
 0x1ac   :  { %v1091_v6 = vmul.f32 %v1849_v29, %v1043_v55 }
 0x1ae   :  { %v1139_v1 = vadd.f32 %v1854_v17, %v1091_v6 }
 0x1b0   :  { %1155 = vst.msk [vmem:[#allocation5 + $0x10] sm:$0xff] %vm47_vm0, %v1139_v1  ;;  %v1289_v1 = vld [vmem:[#allocation2 + $0x70] sm:$0xff] }
 0x1b1   :  { %v959_v7 = vsub.f32 %v1289_v1, %v1856_v34 }
 0x1b2   :  { %v989_v9 = vpop.permute.xlu2 %988 }
 0x1b3   :  { %v1046_v36 = vmul.f32 %v989_v9, %v950_v0  ;;  %v1241_v0 = vld [vmem:[%s1950_s1 + $0x7] ss:$0 sm:$0xff] }
 0x1b5   :  { %v1094_v12 = vmul.f32 %v1231_v61, %v1046_v36  ;;  %v1291_v36 = vld [vmem:[#allocation2 + $0x18] sm:$0xff] }
 0x1b6   :  { %v948_v41 = vsub.f32 %v1291_v36, %v1834_v13  ;;  %v1292_v13 = vld [vmem:[#allocation2 + $0x50] sm:$0xff] }
 0x1b7   :  { %v1142_v46 = vadd.f32 %v1232_v11, %v1094_v12  ;;  %v1242_v12 = vld [vmem:[%s1951_s2 + $0x7] ss:$0 sm:$0xff] }
 0x1b9   :  { %1158 = vst.msk [vmem:[#allocation5 + $0x28] sm:$0xff] %vm47_vm0, %v1142_v46 }
 0x1bd   :  { %v984_v15 = vpop.permute.xlu0 %983 }
 0x1be   :  { %v1045_v37 = vmul.f32 %v984_v15, %v949_v32 }
 0x1bf   :  { %v964_v35 = vpop.permute.xlu1 %963  ;;  %v1004_v40 = vpop.permute.xlu2 %1003 }
 0x1c0   :  { %v1093_v24 = vmul.f32 %v1231_v61, %v1045_v37  ;;  %v1041_v27 = vmul.f32 %v964_v35, %v945_v14  ;;  %v1049_v5 = vmul.f32 %v1004_v40, %v953_v19  ;;  %v1290_v61 = vld [vmem:[#allocation2 + $0x38] sm:$0xff]  ;;  %v955_v19 = vsub.f32 %v1292_v13, %v1859_v44  ;;  %v1293_v35 = vld [vmem:[#allocation2 + $0x60] sm:$0xff] }
 0x1c1   :  { %v952_v9 = vsub.f32 %v1290_v61, %v1844_v52 }
 0x1c2   :  { %v1141_v25 = vadd.f32 %v1232_v11, %v1093_v24  ;;  %v1089_v42 = vmul.f32 %v1233_v63, %v1041_v27  ;;  %v1097_v47 = vmul.f32 %v1879_v18, %v1049_v5  ;;  %v957_v24 = vsub.f32 %v1293_v35, %v1836_v59 }
 0x1c4   :  { %1157 = vst.msk [vmem:[#allocation5 + $0x20] sm:$0xff] %vm47_vm0, %v1141_v25  ;;  %v1137_v23 = vadd.f32 %v1234_v39, %v1089_v42  ;;  %v1145_v21 = vadd.f32 %v1887_v28, %v1097_v47 }
 0x1c6   :  { %1153 = vst.msk [vmem:[#allocation5] sm:$0xff] %vm47_vm0, %v1137_v23  ;;  %v1294_v23 = vld [vmem:[#allocation2 + $0x68] sm:$0xff] }
 0x1c7   :  { %1161 = vst.msk [vmem:[#allocation5 + $0x40] sm:$0xff] %vm47_vm0, %v1145_v21  ;;  %v994_v50 = vpop.permute.xlu1 %993  ;;  %v958_v59 = vsub.f32 %v1294_v23, %v1869_v54  ;;  %v1295_v21 = vld [vmem:[#allocation2 + $0x48] sm:$0xff]  ;;  %v1296_v54 = vld [vmem:[#allocation2 + $0x78] sm:$0xff] }
 0x1c8   :  { %v1047_v43 = vmul.f32 %v994_v50, %v951_v31  ;;  %v1019_v57 = vpop.permute.xlu2 %1018  ;;  %v954_v3 = vsub.f32 %v1295_v21, %v1838_v26 }
 0x1c9   :  { %v1052_v33 = vmul.f32 %v1019_v57, %v956_v49  ;;  %v969_v62 = vpop.permute.xlu0 %968 }
 0x1ca   :  { %v1095_v56 = vmul.f32 %v1237_v48, %v1047_v43  ;;  %v1042_v58 = vmul.f32 %v969_v62, %v946_v45 }
 0x1cb   :  { %v1100_v53 = vmul.f32 %v1239_v2, %v1052_v33 }
 0x1cc   :  { %v1143_v38 = vadd.f32 %v1238_v4, %v1095_v56  ;;  %v1090_v55 = vmul.f32 %v1233_v63, %v1042_v58 }
 0x1cd   :  { %v1148_v6 = vadd.f32 %v1240_v60, %v1100_v53 }
 0x1ce   :  { %1159 = vst.msk [vmem:[#allocation5 + $0x30] sm:$0xff] %vm47_vm0, %v1143_v38  ;;  %v1138_v20 = vadd.f32 %v1234_v39, %v1090_v55 }
 0x1cf   :  { %1164 = vst.msk [vmem:[#allocation5 + $0x58] sm:$0xff] %vm47_vm0, %v1148_v6  ;;  %v979_v10 = vpop.permute.xlu1 %978 }
 0x1d0   :  { %1154 = vst.msk [vmem:[#allocation5 + $0x8] sm:$0xff] %vm47_vm0, %v1138_v20  ;;  %v1034_v11 = vpop.permute.xlu2 %1033  ;;  %v1044_v15 = vmul.f32 %v979_v10, %v948_v41 }
 0x1d1   :  { %v1055_v34 = vmul.f32 %v1034_v11, %v959_v7  ;;  %v999_v46 = vpop.permute.xlu0 %998 }
 0x1d2   :  { %v1048_v32 = vmul.f32 %v999_v46, %v952_v9  ;;  %v1092_v37 = vmul.f32 %v1849_v29, %v1044_v15  ;;  %v1243_v29 = vld [vmem:[%s1950_s1 + $0x6] ss:$0 sm:$0xff]  ;;  %s1354_s1 = smov [#allocation5]  }
 0x1d3   :  { %v1103_v16 = vmul.f32 %v1241_v0, %v1055_v34 }
 0x1d4   :  { %v1096_v14 = vmul.f32 %v1237_v48, %v1048_v32  ;;  %v1140_v30 = vadd.f32 %v1854_v17, %v1092_v37  ;;  %v1244_v17 = vld [vmem:[%s1951_s2 + $0x6] ss:$0 sm:$0xff]  ;;  %s1173_s2 = sshll.u32 %s1354_s1, 4  ;;  %s1174_s2 = int_to_ptr.vmem [resolvable:$true] %s1173_s2 }
 0x1d5   :  { %v1151_v52 = vadd.f32 %v1242_v12, %v1103_v16 }
 0x1d6   :  { %v1144_v63 = vadd.f32 %v1238_v4, %v1096_v14  ;;  %1156 = vst.msk [vmem:[#allocation5 + $0x18] sm:$0xff] %vm47_vm0, %v1140_v30  ;;  %v960_v4 = vsub.f32 %v1296_v54, %v1842_v22 }
 0x1d7   :  { %1167 = vst.msk [vmem:[#allocation5 + $0x70] sm:$0xff] %vm47_vm0, %v1151_v52  ;;  %v1024_v27 = vpop.permute.xlu1 %1023 }
 0x1d8   :  { %1160 = vst.msk [vmem:[#allocation5 + $0x38] sm:$0xff] %vm47_vm0, %v1144_v63  ;;  %v1053_v5 = vmul.f32 %v1024_v27, %v957_v24 }
 0x1d9   :  { %v1014_v39 = vpop.permute.xlu0 %1013 }
 0x1da   :  { %v1051_v40 = vmul.f32 %v1014_v39, %v955_v19  ;;  %v1101_v25 = vmul.f32 %v1243_v29, %v1053_v5 }
 0x1dc   :  { %v1099_v44 = vmul.f32 %v1239_v2, %v1051_v40  ;;  %v1149_v47 = vadd.f32 %v1244_v17, %v1101_v25 }
 0x1de   :  { %v1147_v42 = vadd.f32 %v1240_v60, %v1099_v44  ;;  %1165 = vst.msk [vmem:[#allocation5 + $0x60] sm:$0xff] %vm47_vm0, %v1149_v47 }
 0x1df   :  { %v1009_v48 = vpop.permute.xlu1 %1008 }
 0x1e0   :  { %1163 = vst.msk [vmem:[#allocation5 + $0x50] sm:$0xff] %vm47_vm0, %v1147_v42  ;;  %v1050_v49 = vmul.f32 %v1009_v48, %v954_v3 }
 0x1e1   :  { %v1029_v31 = vpop.permute.xlu0 %1028 }
 0x1e2   :  { %v1054_v8 = vmul.f32 %v1029_v31, %v958_v59  ;;  %v1098_v2 = vmul.f32 %v1879_v18, %v1050_v49 }
 0x1e4   :  { %v1102_v50 = vmul.f32 %v1243_v29, %v1054_v8  ;;  %v1146_v45 = vadd.f32 %v1887_v28, %v1098_v2 }
 0x1e6   :  { %v1150_v51 = vadd.f32 %v1244_v17, %v1102_v50  ;;  %1162 = vst.msk [vmem:[#allocation5 + $0x48] sm:$0xff] %vm47_vm0, %v1146_v45 }
 0x1e7   :  { %v1039_v26 = vpop.permute.xlu1 %1038 }
 0x1e8   :  { %1166 = vst.msk [vmem:[#allocation5 + $0x68] sm:$0xff] %vm47_vm0, %v1150_v51  ;;  %v1056_v43 = vmul.f32 %v1039_v26, %v960_v4 }
 0x1ea   :  { %v1104_v57 = vmul.f32 %v1241_v0, %v1056_v43 }
 0x1ec   :  { %v1152_v18 = vadd.f32 %v1242_v12, %v1104_v57 }
 0x1ee   :  { %1168 = vst.msk [vmem:[#allocation5 + $0x78] sm:$0xff] %vm47_vm0, %v1152_v18 }
 0x1ef   :  { %1181 = dma.vmem_to_hbm [thread:$0]  %s1174_s2, 2048, %s1176_s26, [#allocation4], %s1350_s17, %s1350_s17, %s1351_s18  }
 0x1f0   :  { %1347 = dma.done.wait [#allocation4], 2048  }
 0x1f1   :  { %1348 = vsyncadd [#allocation4], 4294965248 }
 0x1f2   :  { %1186 = vsyncpa [#allocation3], 1 }
 0x1f3   :  { %1187 = vsyncpa [#allocation4], 1 }

</bundles_post_ra>
